<compile_context>
chip_gen: v6e
topology: v6e:2x2x1
jax: 0.10.0
libtpu: 0.0.40
codegen_flags: <defaults>
</compile_context>

<pallas_src>
import functools

import jax
import jax.numpy as jnp
import numpy as np
from jax.experimental import pallas as pl
from jax.experimental.pallas import tpu as pltpu


def _round_up(x, m):
    return (x + m - 1) // m * m


def _head_kernel(x_ref, tags_ref, w1_ref, b1_ref, w2_ref, b2_ref,
                 loss_ref, corr_ref, *, n_rows, tn_rows):
    i = pl.program_id(0)

    # ---- dense -> tanh -> out_proj (bf16 MXU inputs, f32 accumulation) ----
    x = x_ref[...].astype(jnp.bfloat16)                               # (TN, H)
    h = jnp.tanh(jnp.dot(x, w1_ref[...],
                         preferred_element_type=jnp.float32) + b1_ref[...])  # (TN, Ip)
    logits = jnp.dot(h.astype(jnp.bfloat16), w2_ref[...],
                     preferred_element_type=jnp.float32) + b2_ref[...]       # (TN, Cp)

    # Row validity: fused tag/mask stream (tag < 0 -> ignored) AND inside the
    # real row range (the last tile may overhang N with garbage data).
    tags = tags_ref[...]                                              # (TN, 1) i32
    row_ids = jax.lax.broadcasted_iota(jnp.int32, tags.shape, 0) + i * tn_rows
    valid = (tags >= 0) & (row_ids < n_rows)                          # (TN, 1)

    # ---- cross entropy, reduction='sum' over valid tokens (f32) ----
    m = jnp.max(logits, axis=-1, keepdims=True)                       # (TN, 1)
    z = logits - m
    lse = jnp.log(jnp.sum(jnp.exp(z), axis=-1, keepdims=True))        # (TN, 1)
    class_ids = jax.lax.broadcasted_iota(jnp.int32, logits.shape, 1)
    tgt = jnp.sum(jnp.where(class_ids == tags, z, 0.0), axis=-1, keepdims=True)
    ce = lse - tgt                                                    # (TN, 1)

    loss_ref[...] = jnp.sum(jnp.where(valid, ce, 0.0),
                            axis=(0, 1), keepdims=True).reshape(1, 1, 1)

    # Correct iff logits[tag] equals the row max (z at tag == 0); NaN-safe for
    # garbage / ignored rows because `valid` is False there.
    correct = valid & (tgt == 0.0)
    corr_ref[...] = jnp.sum(correct.astype(jnp.float32),
                            axis=(0, 1), keepdims=True
                            ).astype(jnp.int32).reshape(1, 1, 1)


def sequence_tagging_head(features, masked_tokens, tags, params, *, tile_rows=1024):
    """features: (seq, batch, hidden) f32; masked_tokens: (seq, batch) bool;
    tags: (seq, batch) int; params = (w1 (H,I), b1 (1,I) or (I,), w2 (I,C),
    b2 (1,C) or (C,)), weights stored pre-transposed (x @ W).
    Returns (nll_loss scalar f32, ncorrect scalar i32)."""
    seq, batch, hidden = features.shape
    w1, b1, w2, b2 = params
    inner = w1.shape[1]
    num_classes = w2.shape[1]

    n = seq * batch
    ip = _round_up(inner, 128)
    cp = _round_up(num_classes, 128)
    if n <= tile_rows:
        tn = n                                    # single tile == full row extent
    else:
        tn = max(8, (tile_rows // 8) * 8)         # sublane-aligned row tile
    num_tiles = -(-n // tn)                       # cdiv; last tile may overhang

    # ---- streamed inputs: no materialized pad/cast of x (reshape is free) ----
    x2d = features.reshape(n, hidden)             # f32, cast to bf16 in-kernel
    tags_fused = jnp.where(masked_tokens.reshape(-1),
                           tags.reshape(-1).astype(jnp.int32),
                           jnp.int32(-1)).reshape(n, 1)

    # ---- small VMEM-resident weights: lane-pad inner/class dims only ----
    w1_p = jnp.zeros((hidden, ip), jnp.bfloat16).at[:, :inner].set(
        w1.astype(jnp.bfloat16))
    b1_p = jnp.zeros((1, ip), jnp.float32).at[:, :inner].set(
        b1.reshape(1, -1).astype(jnp.float32))
    w2_p = jnp.zeros((ip, cp), jnp.bfloat16).at[:inner, :num_classes].set(
        w2.astype(jnp.bfloat16))
    # Padded class columns get a huge negative bias so they never win the max
    # and contribute 0 to logsumexp (logits stay f32 in-kernel).
    b2_p = jnp.full((1, cp), -1e30, jnp.float32).at[:, :num_classes].set(
        b2.reshape(1, -1).astype(jnp.float32))

    grid_spec = pltpu.PrefetchScalarGridSpec(
        num_scalar_prefetch=0,
        grid=(num_tiles,),
        in_specs=[
            pl.BlockSpec((tn, hidden), lambda i: (i, 0)),   # x: streamed f32
            pl.BlockSpec((tn, 1), lambda i: (i, 0)),        # fused tag/mask
            pl.BlockSpec((hidden, ip), lambda i: (0, 0)),   # w1: VMEM-resident
            pl.BlockSpec((1, ip), lambda i: (0, 0)),        # b1
            pl.BlockSpec((ip, cp), lambda i: (0, 0)),       # w2
            pl.BlockSpec((1, cp), lambda i: (0, 0)),        # b2
        ],
        out_specs=(pl.BlockSpec((1, 1, 1), lambda i: (i, 0, 0)),   # per-tile loss
                   pl.BlockSpec((1, 1, 1), lambda i: (i, 0, 0))),  # per-tile count
    )

    # VMEM budget: streamed tiles (double-buffered) + resident weights (default
    # double-buffering) + h/logits working set + headroom, capped below the
    # physical per-core VMEM so the compiler keeps internal scratch room (v7x).
    x_tile_bytes = tn * hidden * 4
    tag_tile_bytes = tn * 4
    w_bytes = (w1_p.size + w2_p.size) * 2 + (b1_p.size + b2_p.size) * 4
    inter_bytes = tn * (ip + cp) * 4
    needed = (2 * (x_tile_bytes + tag_tile_bytes) + 2 * w_bytes
              + 2 * inter_bytes + (8 << 20))
    try:
        vmem_cap = int(pltpu.get_tpu_info().vmem_capacity_bytes)
    except Exception:
        vmem_cap = 64 << 20                       # conservative (v7x per-core)
    vmem_limit = int(min(max(needed, 32 << 20), max(vmem_cap - (8 << 20), 32 << 20)))

    flops = 2 * n * (hidden * ip + ip * cp)
    bytes_accessed = (x2d.size * 4 + tags_fused.size * 4
                      + w1_p.size * 2 + w2_p.size * 2
                      + (b1_p.size + b2_p.size) * 4 + num_tiles * 8)
    cost = pl.CostEstimate(flops=flops, transcendentals=n * (ip + cp),
                           bytes_accessed=bytes_accessed)

    loss_parts, corr_parts = pl.pallas_call(
        functools.partial(_head_kernel, n_rows=n, tn_rows=tn),
        out_shape=(jax.ShapeDtypeStruct((num_tiles, 1, 1), jnp.float32),
                   jax.ShapeDtypeStruct((num_tiles, 1, 1), jnp.int32)),
        grid_spec=grid_spec,
        compiler_params=pltpu.CompilerParams(
            dimension_semantics=("parallel",),    # independent tiles (v7x 2-TC)
            vmem_limit_bytes=vmem_limit),
        cost_estimate=cost,
    )(x2d, tags_fused, w1_p, b1_p, w2_p, b2_p)

    nll_loss = jnp.sum(loss_parts)                # tiny (num_tiles,) reductions
    ncorrect = jnp.sum(corr_parts)                # exact int32 count
    return nll_loss, ncorrect


def _reference(features, masked_tokens, tags, params):
    # Mirrors the kernel's bf16-matmul / f32-accumulation numerics.
    w1, b1, w2, b2 = params
    x = features.reshape(-1, features.shape[-1]).astype(jnp.bfloat16)
    h = jnp.tanh(jnp.dot(x, w1.astype(jnp.bfloat16),
                         preferred_element_type=jnp.float32)
                 + b1.reshape(1, -1).astype(jnp.float32))
    logits = (jnp.dot(h.astype(jnp.bfloat16), w2.astype(jnp.bfloat16),
                      preferred_element_type=jnp.float32)
              + b2.reshape(1, -1).astype(jnp.float32))
    t = tags.reshape(-1)
    m = masked_tokens.reshape(-1)
    lse = jax.nn.logsumexp(logits, axis=-1)
    ce = lse - jnp.take_along_axis(logits, t[:, None], axis=-1)[:, 0]
    loss = jnp.sum(jnp.where(m, ce, 0.0))
    pred = jnp.argmax(logits, axis=-1)
    ncorrect = jnp.sum(jnp.where(m, (pred == t).astype(jnp.int32), 0))
    return loss, ncorrect


def _make_case(key, seq_length, batch_size, input_dim, inner_dim, num_classes):
    kf, km, kt, kw1, kb1, kw2, kb2 = jax.random.split(key, 7)
    features = jax.random.normal(kf, (seq_length, batch_size, input_dim), jnp.float32)
    masked_tokens = jax.random.uniform(km, (seq_length, batch_size)) > 0.3
    tags = jax.random.randint(kt, (seq_length, batch_size), 0, num_classes, jnp.int32)
    w1 = 0.05 * jax.random.normal(kw1, (input_dim, inner_dim), jnp.float32)
    b1 = 0.01 * jax.random.normal(kb1, (1, inner_dim), jnp.float32)
    w2 = 0.05 * jax.random.normal(kw2, (inner_dim, num_classes), jnp.float32)
    b2 = 0.01 * jax.random.normal(kb2, (1, num_classes), jnp.float32)
    return features, masked_tokens, tags, (w1, b1, w2, b2)


if __name__ == "__main__":
    key = jax.random.PRNGKey(0)
    k1, k2 = jax.random.split(key)

    # Case 1: small shapes (single-tile path), matching the module signature.
    feats, mask, tgs, params = _make_case(k1, 8, 2, 32, 32, 8)
    loss, ncorrect = sequence_tagging_head(feats, mask, tgs, params)
    jax.block_until_ready((loss, ncorrect))
    ref_loss, ref_nc = _reference(feats, mask, tgs, params)
    assert np.allclose(np.asarray(loss), np.asarray(ref_loss),
                       rtol=1e-2, atol=1e-2), (loss, ref_loss)
    assert int(ncorrect) == int(ref_nc), (ncorrect, ref_nc)

    # Case 2: multi-tile path with a row-tail overhang (n=27, tile=16) to
    # exercise the in-kernel validity mask and the "parallel" tile axis.
    feats, mask, tgs, params = _make_case(k2, 9, 3, 64, 48, 5)
    loss, ncorrect = sequence_tagging_head(feats, mask, tgs, params, tile_rows=16)
    jax.block_until_ready((loss, ncorrect))
    ref_loss, ref_nc = _reference(feats, mask, tgs, params)
    assert np.allclose(np.asarray(loss), np.asarray(ref_loss),
                       rtol=1e-2, atol=1e-2), (loss, ref_loss)
    assert int(ncorrect) == int(ref_nc), (ncorrect, ref_nc)

    print("KERNEL_OK")
</pallas_src>

<mosaic_0001>
module attributes {stable_mosaic.version = 11 : i64} {
  func.func @_head_kernel(%arg0: i32, %arg1: memref<16x32xf32, #tpu.memory_space<vmem>>, %arg2: memref<16x1xi32, #tpu.memory_space<vmem>>, %arg3: memref<32x128xbf16, #tpu.memory_space<vmem>>, %arg4: memref<1x128xf32, #tpu.memory_space<vmem>>, %arg5: memref<128x128xbf16, #tpu.memory_space<vmem>>, %arg6: memref<1x128xf32, #tpu.memory_space<vmem>>, %arg7: memref<1x1x1xf32, #tpu.memory_space<vmem>>, %arg8: memref<1x1x1xi32, #tpu.memory_space<vmem>>) attributes {dimension_semantics = [#tpu.dimension_semantics<parallel>], iteration_bounds = array<i64: 1>, scalar_prefetch = 0 : i64, scratch_operands = 0 : i64, tpu.core_type = #tpu.core_type<tc>, window_params = [{transform_indices = @transform_0, window_bounds = array<i64: 16, 32>}, {transform_indices = @transform_1, window_bounds = array<i64: 16, 1>}, {pipeline_mode = #tpu.pipeline_mode<synchronous>, transform_indices = @transform_2, window_bounds = array<i64: 32, 128>}, {pipeline_mode = #tpu.pipeline_mode<synchronous>, transform_indices = @transform_3, window_bounds = array<i64: 1, 128>}, {pipeline_mode = #tpu.pipeline_mode<synchronous>, transform_indices = @transform_4, window_bounds = array<i64: 128, 128>}, {pipeline_mode = #tpu.pipeline_mode<synchronous>, transform_indices = @transform_5, window_bounds = array<i64: 1, 128>}, {transform_indices = @transform_6, window_bounds = array<i64: 1, 1, 1>}, {transform_indices = @transform_7, window_bounds = array<i64: 1, 1, 1>}]} {
    %c0 = arith.constant 0 : index
    %c0_0 = arith.constant 0 : index
    %0 = vector.load %arg1[%c0, %c0_0] : memref<16x32xf32, #tpu.memory_space<vmem>>, vector<16x32xf32>
    %1 = arith.truncf %0 : vector<16x32xf32> to vector<16x32xbf16>
    %c0_1 = arith.constant 0 : index
    %c0_2 = arith.constant 0 : index
    %2 = vector.load %arg3[%c0_1, %c0_2] : memref<32x128xbf16, #tpu.memory_space<vmem>>, vector<32x128xbf16>
    %cst = arith.constant dense<0.000000e+00> : vector<16x128xf32>
    %3 = tpu.matmul %1, %2, %cst {dimension_numbers = #tpu.dot_dimension_numbers<[1], [0], [0], [1], [0, 0, 1, 1], [], []>} : vector<16x32xbf16>, vector<32x128xbf16>, vector<16x128xf32> -> vector<16x128xf32>
    %c0_3 = arith.constant 0 : index
    %c0_4 = arith.constant 0 : index
    %4 = vector.load %arg4[%c0_3, %c0_4] : memref<1x128xf32, #tpu.memory_space<vmem>>, vector<1x128xf32>
    %5 = vector.broadcast %4 : vector<1x128xf32> to vector<16x128xf32>
    %6 = arith.addf %3, %5 : vector<16x128xf32>
    %7 = math.tanh %6 : vector<16x128xf32>
    %8 = arith.truncf %7 : vector<16x128xf32> to vector<16x128xbf16>
    %c0_5 = arith.constant 0 : index
    %c0_6 = arith.constant 0 : index
    %9 = vector.load %arg5[%c0_5, %c0_6] : memref<128x128xbf16, #tpu.memory_space<vmem>>, vector<128x128xbf16>
    %cst_7 = arith.constant dense<0.000000e+00> : vector<16x128xf32>
    %10 = tpu.matmul %8, %9, %cst_7 {dimension_numbers = #tpu.dot_dimension_numbers<[1], [0], [0], [1], [0, 0, 1, 1], [], []>} : vector<16x128xbf16>, vector<128x128xbf16>, vector<16x128xf32> -> vector<16x128xf32>
    %c0_8 = arith.constant 0 : index
    %c0_9 = arith.constant 0 : index
    %11 = vector.load %arg6[%c0_8, %c0_9] : memref<1x128xf32, #tpu.memory_space<vmem>>, vector<1x128xf32>
    %12 = vector.broadcast %11 : vector<1x128xf32> to vector<16x128xf32>
    %13 = arith.addf %10, %12 : vector<16x128xf32>
    %c0_10 = arith.constant 0 : index
    %c0_11 = arith.constant 0 : index
    %14 = vector.load %arg2[%c0_10, %c0_11] : memref<16x1xi32, #tpu.memory_space<vmem>>, vector<16x1xi32>
    %15 = tpu.iota {dimensions = array<i32: 0>} : vector<16x1xi32>
    %c16_i32 = arith.constant 16 : i32
    %16 = arith.muli %arg0, %c16_i32 : i32
    %17 = vector.broadcast %16 : i32 to vector<16x1xi32>
    %18 = arith.addi %15, %17 : vector<16x1xi32>
    %c0_i32 = arith.constant 0 : i32
    %19 = vector.broadcast %c0_i32 : i32 to vector<16x1xi32>
    %20 = arith.cmpi sge, %14, %19 : vector<16x1xi32>
    %c16_i32_12 = arith.constant 16 : i32
    %21 = vector.broadcast %c16_i32_12 : i32 to vector<16x1xi32>
    %22 = arith.cmpi slt, %18, %21 : vector<16x1xi32>
    %23 = arith.andi %20, %22 : vector<16x1xi1>
    %cst_13 = arith.constant dense<0xFF800000> : vector<16xf32>
    %24 = vector.multi_reduction <maximumf>, %13, %cst_13 [1] : vector<16x128xf32> to vector<16xf32>
    %25 = vector.shape_cast %24 : vector<16xf32> to vector<16x1xf32>
    %26 = vector.broadcast %25 : vector<16x1xf32> to vector<16x128xf32>
    %27 = arith.subf %13, %26 : vector<16x128xf32>
    %28 = math.exp %27 : vector<16x128xf32>
    %cst_14 = arith.constant dense<0.000000e+00> : vector<16xf32>
    %29 = vector.multi_reduction <add>, %28, %cst_14 [1] : vector<16x128xf32> to vector<16xf32>
    %30 = vector.shape_cast %29 : vector<16xf32> to vector<16x1xf32>
    %31 = math.log %30 : vector<16x1xf32>
    %32 = tpu.iota {dimensions = array<i32: 1>} : vector<16x128xi32>
    %33 = vector.broadcast %14 : vector<16x1xi32> to vector<16x128xi32>
    %34 = arith.cmpi eq, %32, %33 : vector<16x128xi32>
    %cst_15 = arith.constant 0.000000e+00 : f32
    %35 = vector.broadcast %cst_15 : f32 to vector<16x128xf32>
    %36 = arith.select %34, %27, %35 : vector<16x128xi1>, vector<16x128xf32>
    %cst_16 = arith.constant dense<0.000000e+00> : vector<16xf32>
    %37 = vector.multi_reduction <add>, %36, %cst_16 [1] : vector<16x128xf32> to vector<16xf32>
    %38 = vector.shape_cast %37 : vector<16xf32> to vector<16x1xf32>
    %39 = arith.subf %31, %38 : vector<16x1xf32>
    %cst_17 = arith.constant 0.000000e+00 : f32
    %40 = vector.broadcast %cst_17 : f32 to vector<16x1xf32>
    %41 = arith.select %23, %39, %40 : vector<16x1xi1>, vector<16x1xf32>
    %42 = vector.shape_cast %41 : vector<16x1xf32> to vector<1x16x1xf32>
    %cst_18 = arith.constant dense<0.000000e+00> : vector<1xf32>
    %43 = vector.multi_reduction <add>, %42, %cst_18 [1, 2] : vector<1x16x1xf32> to vector<1xf32>
    %44 = vector.shape_cast %43 : vector<1xf32> to vector<1x1x1xf32>
    %45 = vector.extract %44[0, 0, 0] : f32 from vector<1x1x1xf32>
    %46 = vector.broadcast %45 : f32 to vector<1x1xf32>
    %47 = vector.shape_cast %46 : vector<1x1xf32> to vector<1x1x1xf32>
    %c0_19 = arith.constant 0 : index
    %c0_20 = arith.constant 0 : index
    %c0_21 = arith.constant 0 : index
    %48 = vector.load %arg7[%c0_19, %c0_20, %c0_21] : memref<1x1x1xf32, #tpu.memory_space<vmem>>, vector<1x1x1xf32>
    tpu.vector_store %arg7[%c0_19, %c0_20, %c0_21], %47 {strides = array<i32>} : memref<1x1x1xf32, #tpu.memory_space<vmem>>, vector<1x1x1xf32>,
    %cst_22 = arith.constant 0.000000e+00 : f32
    %49 = vector.broadcast %cst_22 : f32 to vector<16x1xf32>
    %50 = arith.cmpf oeq, %38, %49 : vector<16x1xf32>
    %51 = arith.andi %23, %50 : vector<16x1xi1>
    %52 = arith.extui %51 : vector<16x1xi1> to vector<16x1xi32>
    %53 = arith.sitofp %52 : vector<16x1xi32> to vector<16x1xf32>
    %54 = vector.shape_cast %53 : vector<16x1xf32> to vector<1x16x1xf32>
    %cst_23 = arith.constant dense<0.000000e+00> : vector<1xf32>
    %55 = vector.multi_reduction <add>, %54, %cst_23 [1, 2] : vector<1x16x1xf32> to vector<1xf32>
    %56 = vector.shape_cast %55 : vector<1xf32> to vector<1x1x1xf32>
    %57 = vector.extract %56[0, 0, 0] : f32 from vector<1x1x1xf32>
    %58 = vector.broadcast %57 : f32 to vector<1x1xf32>
    %59 = arith.fptosi %58 : vector<1x1xf32> to vector<1x1xi32>
    %60 = vector.shape_cast %59 : vector<1x1xi32> to vector<1x1x1xi32>
    %c0_24 = arith.constant 0 : index
    %c0_25 = arith.constant 0 : index
    %c0_26 = arith.constant 0 : index
    %61 = vector.load %arg8[%c0_24, %c0_25, %c0_26] : memref<1x1x1xi32, #tpu.memory_space<vmem>>, vector<1x1x1xi32>
    tpu.vector_store %arg8[%c0_24, %c0_25, %c0_26], %60 {strides = array<i32>} : memref<1x1x1xi32, #tpu.memory_space<vmem>>, vector<1x1x1xi32>,
    return
  }
  func.func @transform_0(%arg0: i32) -> (i32, i32) {
    %c0_i32 = arith.constant 0 : i32
    %c0_i32_0 = arith.constant 0 : i32
    return %arg0, %c0_i32 : i32, i32
  }
  func.func @transform_1(%arg0: i32) -> (i32, i32) {
    %c0_i32 = arith.constant 0 : i32
    %c0_i32_0 = arith.constant 0 : i32
    return %arg0, %c0_i32 : i32, i32
  }
  func.func @transform_2(%arg0: i32) -> (i32, i32) {
    %c0_i32 = arith.constant 0 : i32
    %c0_i32_0 = arith.constant 0 : i32
    %c0_i32_1 = arith.constant 0 : i32
    return %c0_i32, %c0_i32_0 : i32, i32
  }
  func.func @transform_3(%arg0: i32) -> (i32, i32) {
    %c0_i32 = arith.constant 0 : i32
    %c0_i32_0 = arith.constant 0 : i32
    %c0_i32_1 = arith.constant 0 : i32
    return %c0_i32, %c0_i32_0 : i32, i32
  }
  func.func @transform_4(%arg0: i32) -> (i32, i32) {
    %c0_i32 = arith.constant 0 : i32
    %c0_i32_0 = arith.constant 0 : i32
    %c0_i32_1 = arith.constant 0 : i32
    return %c0_i32, %c0_i32_0 : i32, i32
  }
  func.func @transform_5(%arg0: i32) -> (i32, i32) {
    %c0_i32 = arith.constant 0 : i32
    %c0_i32_0 = arith.constant 0 : i32
    %c0_i32_1 = arith.constant 0 : i32
    return %c0_i32, %c0_i32_0 : i32, i32
  }
  func.func @transform_6(%arg0: i32) -> (i32, i32, i32) {
    %c0_i32 = arith.constant 0 : i32
    %c0_i32_0 = arith.constant 0 : i32
    %c0_i32_1 = arith.constant 0 : i32
    return %arg0, %c0_i32, %c0_i32_0 : i32, i32, i32
  }
  func.func @transform_7(%arg0: i32) -> (i32, i32, i32) {
    %c0_i32 = arith.constant 0 : i32
    %c0_i32_0 = arith.constant 0 : i32
    %c0_i32_1 = arith.constant 0 : i32
    return %arg0, %c0_i32, %c0_i32_0 : i32, i32, i32
  }
}

</mosaic_0001>

<bundles_post_ra>
// kernel: tpu_custom_call.1
= control target key start
LH: loop header
LB: loop body
LE: loop exit
PB: predicated region body
PF: predicated region fallthrough
CT: control target
= control target key end

     0   :  { %13 = vsyncpa [#allocation3], 0  ;;  %s655_s0 = inlined_call_operand.vmem [shape: f32[16,32], index: 0, kind: input, shape index: {}]   ;;  %s656_s1 = inlined_call_operand.vmem [shape: s32[16,1], index: 1, kind: input, shape index: {}]   ;;  %s657_s2 = inlined_call_operand.hbm [shape: bf16[32,128], index: 2, kind: input, shape index: {}]   ;;  %s658_s3 = inlined_call_operand.vmem [shape: f32[1,128], index: 3, kind: input, shape index: {}]   ;;  %s659_s4 = inlined_call_operand.hbm [shape: bf16[128,128], index: 4, kind: input, shape index: {}]   ;;  %s660_s5 = inlined_call_operand.vmem [shape: f32[1,128], index: 5, kind: input, shape index: {}]   ;;  %s661_s6 = inlined_call_operand.hbm [shape: f32[1,1,1], index: 6, kind: output, shape index: {0}]   ;;  %s662_s7 = inlined_call_operand.hbm [shape: s32[1,1,1], index: 7, kind: output, shape index: {1}]  }
   0x1   :  { %14 = vsyncpa [#allocation6], 0 }
   0x2   :  { %15 = vsyncpa [#allocation4], 0 }
   0x3   :  { %16 = vsyncpa [#allocation9], 0  ;;  %s546_s24 = smov [#allocation2]  }
   0x4   :  { %s26_s25 = sshll.u32 %s546_s24, 4  ;;  %s27_s25 = int_to_ptr.vmem [resolvable:$true] %s26_s25 }
   0x5   :  { %s466_s26 = scalar_lea.vmem %s27_s25, 256  ;;  %p471_p1 = scmp.lt.s32.totalorder %s27_s25, %s27_s25 }
   0x6   :  { %p467_p0 = scmp.ne.s32.totalorder %s27_s25, %s466_s26  ;;  %p472_p2 = scmp.lt.s32.totalorder %s466_s26, %s466_s26 }
   0x8   :  { %p473_p3 = por %p472_p2, %p471_p1 }
   0xa   :  { %p474_p4 = pnand %p473_p3, %p467_p0 }
   0xc   :  { %477 = shalt.err (!%p474_p4)
}
   0xd   :  { %s547_s27 = smov 64   ;;  %s548_s28 = smov 4  }
   0xe   :  { %32 = dma.hbm_to_vmem [thread:$0]  %s657_s2, 256, %s27_s25, [#allocation3], %s547_s27, %s547_s27, %s548_s28  }
   0xf   :  { %s549_s8 = smov [#allocation5]  }
  0x10   :  { %s40_s9 = sshll.u32 %s549_s8, 4  ;;  %s41_s9 = int_to_ptr.vmem [resolvable:$true] %s40_s9 }
  0x11   :  { %s486_s10 = scalar_lea.vmem %s41_s9, 1024  ;;  %p491_p6 = scmp.lt.s32.totalorder %s41_s9, %s41_s9 }
  0x12   :  { %p487_p5 = scmp.ne.s32.totalorder %s41_s9, %s486_s10  ;;  %p492_p7 = scmp.lt.s32.totalorder %s486_s10, %s486_s10 }
  0x14   :  { %p493_p8 = por %p492_p7, %p491_p6 }
  0x16   :  { %p494_p9 = pnand %p493_p8, %p487_p5 }
  0x18   :  { %497 = shalt.err (!%p494_p9)
}
  0x19   :  { %46 = dma.hbm_to_vmem [thread:$0]  %s659_s4, 1024, %s41_s9, [#allocation6], %s547_s27, %s547_s27, %s548_s28  }
  0x1a   :  { %538 = dma.done.wait [#allocation3], 256  }
  0x1b   :  { %539 = vsyncadd [#allocation3], 4294967040 }
  0x1c   :  { %540 = dma.done.wait [#allocation6], 1024  }
  0x1d   :  { %541 = vsyncadd [#allocation6], 4294966272  ;;  %v550_v0 = vmov 0.0   ;;  %vm551_vm0 = vmmov 0   ;;  %v436_v1 = vld [vmem:[#allocation2 + $0x8] sm:$0xff]   ;;  %v437_v2 = vld [vmem:[#allocation2] sm:$0xff]   ;;  %v275_v40 = vlaneseq }
  0x1e   :  { %391 = vmatprep.subr.bf16.mxu0 %v550_v0  ;;  %395 = vmatprep.mubr.msk.bf16.mxu0 %vm551_vm0, %v550_v0  ;;  %v56_v3 = vld [vmem:[%s655_s0] sm:$0xff]  ;;  %v57_v4 = vld [vmem:[%s655_s0 + $0x8] sm:$0xff]  ;;  %vm82_vm1 = vcmask 261120   ;;  %v440_v8 = vld [vmem:[#allocation5 + $0x28] sm:$0xff]   ;;  %v552_v25 = vmov 0   ;;  %vm295_vm9 = vcmask 7168  }
  0x1f   :  { %399 = vmatprep.subr.bf16.mxu1 %v550_v0  ;;  %415 = vmatprep.mubr.msk.bf16.mxu1 %vm551_vm0, %v550_v0  ;;  %v438_v5 = vld [vmem:[#allocation5 + $0x38] sm:$0xff]   ;;  %v439_v6 = vld [vmem:[#allocation5 + $0x30] sm:$0xff]   ;;  %v58_v7 = vpack.c.bf16 %v57_v4, %v56_v3  ;;  %v441_v9 = vld [vmem:[#allocation5 + $0x20] sm:$0xff]   ;;  %v276_v42 = vand.u32 127, %v275_v40  ;;  %vm309_vm11 = vcmask 0  }
  0x20   :  { %392 = vmatpush3.bf16.msra.mxu0 %v436_v1  ;;  %400 = vmatpush3.bf16.msra.mxu1 %v438_v5  ;;  %v442_v10 = vld [vmem:[#allocation5 + $0x18] sm:$0xff]   ;;  %v443_v11 = vld [vmem:[#allocation5 + $0x10] sm:$0xff]   ;;  %v444_v12 = vld [vmem:[#allocation5 + $0x8] sm:$0xff]  }
  0x21   :  { %393 = vmatprep.subr.bf16.mxu0 %v550_v0  ;;  %401 = vmatprep.subr.bf16.mxu1 %v550_v0  ;;  %v445_v13 = vld [vmem:[#allocation5] sm:$0xff]   ;;  %v364_v14 = vld [vmem:[%s658_s3] ss:$0 sm:$0xff]  ;;  %v243_v26 = vld [vmem:[%s656_s1 + $0x8] sm:$0xff] }
  0x22   :  { %v625_v24 = vld [vmem:[%s656_s1] sm:$0xff]  ;;  %434 = vset.pattern.permute.xlu1 %v552_v25  ;;  %435 = vset.pattern.permute.xlu0 %v552_v25  ;;  %vm252_vm7 = vcmp.ge.s32.totalorder %v243_v26, 0  ;;  %s553_s1 = smov [#allocation7]  }
  0x23   :  { %278 = vperm.xlu1 %434, %v625_v24   ;;  %v368_v27 = vld [vmem:[%s660_s5] ss:$0 sm:$0xff]  ;;  %vm251_vm4 = vcmp.ge.s32.totalorder %v625_v24, 0  ;;  %s340_s5 = sshll.u32 %s553_s1, 4  ;;  %s341_s5 = int_to_ptr.vmem [resolvable:$true] %s340_s5 }
  0x24   :  { %394 = vmatpush3.bf16.msra.mxu0 %v437_v2  ;;  %402 = vmatpush3.bf16.msra.mxu1 %v439_v6  ;;  %s498_s22 = scalar_lea.vmem %s341_s5, 16  ;;  %s502_s23 = scalar_lea.vmem %s341_s5, 32 }
  0x25   :  { %403 = vmatprep.subr.bf16.mxu1 %v550_v0  ;;  %p499_p10 = scmp.ne.s32.totalorder %s341_s5, %s498_s22  ;;  %p503_p11 = scmp.lt.s32.totalorder %s341_s5, %s341_s5 }
  0x26   :  { %p504_p12 = scmp.lt.s32.totalorder %s502_s23, %s498_s22 }
  0x27   :  { %396 = vmatmul.mubr.msk.bf16.vlgmr.msra.gmra.mxu0 %vm82_vm1, %v58_v7  ;;  %281 = vperm.xlu1 %434, %v243_v26  }
  0x28   :  { %404 = vmatpush3.bf16.msra.mxu1 %v440_v8  ;;  %p505_p13 = por %p504_p12, %p503_p11 }
  0x29   :  { %405 = vmatprep.subr.bf16.mxu1 %v550_v0 }
  0x2a   :  { %p506_p0 = pnand %p505_p13, %p499_p10 }
  0x2c   :  { %406 = vmatpush3.bf16.msra.mxu1 %v441_v9 }
  0x2d   :  { %407 = vmatprep.subr.bf16.mxu1 %v550_v0 }
  0x30   :  { %408 = vmatpush3.bf16.msra.mxu1 %v442_v10 }
  0x31   :  { %409 = vmatprep.subr.bf16.mxu1 %v550_v0 }
  0x34   :  { %410 = vmatpush3.bf16.msra.mxu1 %v443_v11 }
  0x35   :  { %411 = vmatprep.subr.bf16.mxu1 %v550_v0 }
  0x38   :  { %412 = vmatpush3.bf16.msra.mxu1 %v444_v12 }
  0x39   :  { %413 = vmatprep.subr.bf16.mxu1 %v550_v0 }
  0x3c   :  { %414 = vmatpush3.bf16.msra.mxu1 %v445_v13 }
  0x9e   :  { %v279_v41 = vpop.permute.xlu1 %278 }
  0x9f   :  { %vm283_vm2 = vcmp.eq.s32.totalorder %v276_v42, %v279_v41 }
  0xa2   :  { %v282_v44 = vpop.permute.xlu1 %281 }
  0xa3   :  { %vm284_vm3 = vcmp.eq.s32.totalorder %v276_v42, %v282_v44 }
  0xe7   :  { %v120_v15 = vpop.f32.mrf.mxu0 }
  0xe8   :  { %v121_v16 = vadd.f32 %v364_v14, %v120_v15 }
  0xe9   :  { %v397_v17 = vpop.f32.mrf.mxu0 }
  0xea   :  { %446 = vtanh.f32 %v121_v16 }
  0xeb   :  { %v123_v18 = vpop.f32.mrf.mxu0 }
  0xec   :  { %v124_v19 = vadd.f32 %v364_v14, %v123_v18 }
  0xed   :  { %v398_v20 = vpop.f32.mrf.mxu0 }
  0xee   :  { %448 = vtanh.f32 %v124_v19 }
  0xf7   :  { %v447_v21 = vpop.eup %446 }
  0xfb   :  { %v449_v22 = vpop.eup %448 }
  0xfc   :  { %v129_v23 = vpack.c.bf16 %v449_v22, %v447_v21 }
  0xfe   :  { %416 = vmatmul.mubr.bf16.vlgmr.msra.gmra.mxu1 %v129_v23 }
 0x1be   :  { %v235_v28 = vpop.f32.mrf.mxu1 }
 0x1bf   :  { %v236_v29 = vadd.f32 %v368_v27, %v235_v28 }
 0x1c0   :  { %v417_v30 = vpop.f32.mrf.mxu1 }
 0x1c1   :  { %257 = vmax.xlane.f32.xlu0 %v236_v29 }
 0x1c2   :  { %v238_v31 = vpop.f32.mrf.mxu1 }
 0x1c3   :  { %v239_v32 = vadd.f32 %v368_v27, %v238_v31 }
 0x1c4   :  { %v418_v33 = vpop.f32.mrf.mxu1 }
 0x1c5   :  { %259 = vmax.xlane.f32.xlu0 %v239_v32 }
 0x24a   :  { %v258_v34 = vpop.xlane.xlu0 %257 }
 0x24b   :  { %v261_v35 = vsub.f32 %v236_v29, %v258_v34 }
 0x24d   :  { %v263_v36 = vmul.f32 1.442695, %v261_v35  ;;  %v285_v46 = vsel %vm283_vm2, %v261_v35, 0.0 }
 0x24e   :  { %v260_v37 = vpop.xlane.xlu0 %259 }
 0x24f   :  { %450 = vpow2.f32 %v263_v36  ;;  %v262_v38 = vsub.f32 %v239_v32, %v260_v37 }
 0x251   :  { %v265_v39 = vmul.f32 1.442695, %v262_v38  ;;  %v286_v47 = vsel %vm284_vm3, %v262_v38, 0.0 }
 0x253   :  { %452 = vpow2.f32 %v265_v39 }
 0x25c   :  { %v451_v43 = vpop.eup %450 }
 0x25d   :  { %267 = vadd.xlane.f32.xlu0 %v451_v43 }
 0x260   :  { %v453_v45 = vpop.eup %452 }
 0x261   :  { %287 = vadd.xlane.f32.xlu0 %v285_v46  ;;  %269 = vadd.xlane.f32.xlu1 %v453_v45 }
 0x265   :  { %289 = vadd.xlane.f32.xlu0 %v286_v47 }
 0x2e6   :  { %v268_v48 = vpop.xlane.xlu0 %267 }
 0x2e7   :  { %454 = vlog2.f32 %v268_v48 }
 0x2ea   :  { %v270_v49 = vpop.xlane.xlu1 %269  ;;  %v288_v50 = vpop.xlane.xlu0 %287 }
 0x2eb   :  { %456 = vlog2.f32 %v270_v49  ;;  %vm311_vm5 = vcmp.eq.f32.partialorder %v288_v50, 0.0 }
 0x2ec   :  { %vm313_vm6 = vmand %vm251_vm4, %vm311_vm5 }
 0x2ed   :  { %v377_v52 = vsel %vm313_vm6, 1.0, %v550_v0 }
 0x2ee   :  { %v290_v51 = vpop.xlane.xlu0 %289  ;;  %v319_v54 = vsel %vm295_vm9, %v377_v52, 0.0 }
 0x2ef   :  { %vm312_vm8 = vcmp.eq.f32.partialorder %v290_v51, 0.0 }
 0x2f0   :  { %vm314_vm10 = vmand %vm252_vm7, %vm312_vm8 }
 0x2f1   :  { %v378_v53 = vsel %vm314_vm10, 1.0, %v550_v0 }
 0x2f2   :  { %v320_v55 = vsel %vm295_vm9, %v378_v53, 0.0 }
 0x2f3   :  { %v321_v56 = vadd.f32 %v320_v55, %v319_v54 }
 0x2f4   :  { %v455_v57 = vpop.eup %454 }
 0x2f5   :  { %v272_v58 = vmul.f32 0.6931472, %v455_v57 }
 0x2f7   :  { %v291_v59 = vsub.f32 %v272_v58, %v288_v50 }
 0x2f8   :  { %v457_v60 = vpop.eup %456 }
 0x2f9   :  { %v274_v61 = vmul.f32 0.6931472, %v457_v60  ;;  %v293_v63 = vsel %vm251_vm4, %v291_v59, 0.0 }
 0x2fa   :  { %v296_v2 = vsel %vm295_vm9, %v293_v63, 0.0 }
 0x2fb   :  { %v292_v62 = vsub.f32 %v274_v61, %v290_v51 }
 0x2fd   :  { %v294_v1 = vsel %vm252_vm7, %v292_v62, 0.0 }
 0x2fe   :  { %v297_v0 = vsel %vm295_vm9, %v294_v1, 0.0 }
 0x2ff   :  { %v298_v3 = vadd.f32 %v297_v0, %v296_v2 }
 0x301   :  { %299 = vadd.xlane.f32.xlu0 %v298_v3 }
 0x305   :  { %322 = vadd.xlane.f32.xlu0 %v321_v56 }
 0x38a   :  { %v300_v4 = vpop.xlane.xlu0 %299 }
 0x38b   :  { %v301_v5 = vrot.slane %v300_v4, 4 }
 0x38d   :  { %v302_v6 = vadd.f32 %v301_v5, %v300_v4 }
 0x38e   :  { %v323_v7 = vpop.xlane.xlu0 %322 }
 0x38f   :  { %v303_v8 = vrot.slane %v302_v6, 2  ;;  %v324_v9 = vrot.slane %v323_v7, 4 }
 0x391   :  { %v325_v10 = vadd.f32 %v324_v9, %v323_v7  ;;  %v304_v11 = vadd.f32 %v303_v8, %v302_v6 }
 0x393   :  { %v326_v12 = vrot.slane %v325_v10, 2  ;;  %v305_v13 = vrot.slane %v304_v11, 1 }
 0x395   :  { %v327_v14 = vadd.f32 %v326_v12, %v325_v10  ;;  %v306_v15 = vadd.f32 %v305_v13, %v304_v11 }
 0x397   :  { %419 = vpush %v306_v15  ;;  %v328_v16 = vrot.slane %v327_v14, 1 }
 0x399   :  { %v329_v17 = vadd.f32 %v328_v16, %v327_v14 }
 0x39b   :  { %421 = vpush %v329_v17 }
 0x3c8   :  { %s420_s21 = spop %419 }
 0x3c9   :  { %v308_v18 = vstv %s420_s21 }
 0x3ca   :  { %310 = vst.msk [vmem:[#allocation7] sm:$0x1] %vm309_vm11, %v308_v18 }
 0x3cb   :  { %509 = shalt.err (!%p506_p0)
}
 0x3cc   :  { %343 = dma.vmem_to_hbm [thread:$0]  %s341_s5, 16, %s661_s6, [#allocation4]  }
 0x3cd   :  { %s422_s26 = spop %421  ;;  %s554_s27 = smov [#allocation8]  }
 0x3ce   :  { %v331_v19 = vstv %s422_s26  ;;  %s350_s28 = sshll.u32 %s554_s27, 4  ;;  %s351_s28 = int_to_ptr.vmem [resolvable:$true] %s350_s28 }
 0x3cf   :  { %v423_v20 = vtrunc.f32 %v331_v19  ;;  %s518_s29 = scalar_lea.vmem %s351_s28, 16  ;;  %s522_s30 = scalar_lea.vmem %s351_s28, 32 }
 0x3d0   :  { %p519_p1 = scmp.ne.s32.totalorder %s351_s28, %s518_s29  ;;  %p523_p2 = scmp.lt.s32.totalorder %s351_s28, %s351_s28 }
 0x3d1   :  { %v424_v21 = vcvt.f32.s32 %v423_v20  ;;  %p524_p3 = scmp.lt.s32.totalorder %s522_s30, %s518_s29 }
 0x3d3   :  { %333 = vst.msk [vmem:[#allocation8] sm:$0x1] %vm309_vm11, %v424_v21  ;;  %p525_p4 = por %p524_p3, %p523_p2 }
 0x3d5   :  { %p526_p5 = pnand %p525_p4, %p519_p1 }
 0x3d7   :  { %529 = shalt.err (!%p526_p5)
}
 0x3d8   :  { %353 = dma.vmem_to_hbm [thread:$0]  %s351_s28, 16, %s662_s7, [#allocation9]  }
 0x3d9   :  { %542 = dma.done.wait [#allocation4], 16  }
 0x3da   :  { %543 = vsyncadd [#allocation4], 4294967280 }
 0x3db   :  { %544 = dma.done.wait [#allocation9], 16  }
 0x3dc   :  { %545 = vsyncadd [#allocation9], 4294967280 }
 0x3dd   :  { %360 = vsyncpa [#allocation3], 1 }
 0x3de   :  { %361 = vsyncpa [#allocation6], 1 }
 0x3df   :  { %362 = vsyncpa [#allocation4], 1 }
 0x3e0   :  { %363 = vsyncpa [#allocation9], 1 }

</bundles_post_ra>
